<compile_context>
chip_gen: v7x
topology: tpu7x:2x2x1
jax: 0.10.0
libtpu: 0.0.40
codegen_flags: <defaults>
</compile_context>

<pallas_src>
import jax
import jax.numpy as jnp
import numpy as np
from jax.experimental import pallas as pl
from jax.experimental.pallas import tpu as pltpu


def _round_up(x, m):
    return ((x + m - 1) // m) * m


def _cdiv(a, b):
    return -(-a // b)


# ----------------------------- shared in-kernel helpers -----------------------------
def _segment_sums(lab, feat, kp):
    """lab [1,T] int32, feat [T,C] f32 -> per-class sums [kp,C], counts [kp,1]."""
    t = feat.shape[0]
    kio = jax.lax.broadcasted_iota(jnp.int32, (kp, t), 0)
    oh_t = (lab == kio).astype(jnp.float32)                       # [kp, T]; label < 0 never matches
    csum = jax.lax.dot_general(oh_t, feat, (((1,), (0,)), ((), ())),
                               preferred_element_type=jnp.float32)  # [kp, C] (natural MXU layout)
    cnt = jnp.sum(oh_t, axis=1, keepdims=True)                      # [kp, 1]
    return csum, cnt


def _tightness(lab, feat, p):
    """Weighted tightness partial sums in [K, N] layout.

    lab [1,T] int32 (invalid rows == -1), feat [T,C] f32, p [kp,C] normalized prototypes.
    Returns (tsum, tcnt) each shaped (1, 1).
    tight_i = ||normalize(f_i) - p[label_i]||^2 = 1 + ||p||^2 - 2 * fn_i . p[label_i]  (clamped at 0).
    """
    kp = p.shape[0]
    t = feat.shape[0]
    inv_nrm = jax.lax.rsqrt(jnp.maximum(jnp.sum(feat * feat, axis=1, keepdims=True), 1e-24))  # [T,1]
    fn = feat * inv_nrm                                             # [T, C] normalized features
    # [kp, T] = p @ fn.T  (rhs-transposed contraction, same pattern as q @ k.T in flash attention)
    s = jax.lax.dot_general(p, fn, (((1,), (1,)), ((), ())),
                            preferred_element_type=jnp.float32)
    kio = jax.lax.broadcasted_iota(jnp.int32, (kp, t), 0)
    oh_t = (lab == kio).astype(jnp.float32)                         # [kp, T]
    psq = jnp.sum(p * p, axis=1, keepdims=True)                     # [kp, 1]  (~1 for present classes)
    s_sel = jnp.sum(oh_t * s, axis=0, keepdims=True)                # [1, T]  fn_i . p[label_i]
    pres = jnp.sum(oh_t * psq, axis=0, keepdims=True)               # [1, T]  ||p[label_i]||^2
    valid = lab >= 0                                                # [1, T]
    tight = jnp.maximum(1.0 + pres - 2.0 * s_sel, 0.0)              # [1, T]
    tmask = (tight > 0.0) & valid
    w = lab.astype(jnp.float32)                                     # label value doubles as the weight
    tsum = jnp.sum(jnp.where(tmask, tight * w, 0.0), axis=1, keepdims=True)    # (1, 1)
    tcnt = jnp.sum(tmask.astype(jnp.float32), axis=1, keepdims=True)           # (1, 1)
    return tsum, tcnt


# ----------------------------- streaming kernels (two-pass path) -----------------------------
def _make_stream_kernels(n, tile_n, steps, kp):
    """Kernels closing over static n / tile_n / steps; mask ragged & duplicate tiles by row index."""

    def _masked_inputs(lab_ref, feat_ref):
        g = pl.program_id(0) * steps + pl.program_id(1)             # UNCLAMPED global block id
        row0 = g * tile_n
        lane = jax.lax.broadcasted_iota(jnp.int32, (1, tile_n), 1)
        sub = jax.lax.broadcasted_iota(jnp.int32, (tile_n, 1), 0)
        lab = jnp.where(row0 + lane < n, lab_ref[...], -1)          # OOB/duplicate rows -> ignore
        feat = jnp.where(row0 + sub < n, feat_ref[...], 0.0)        # zero garbage rows (NaN safety)
        return lab, feat

    def center_kernel(lab_ref, feat_ref, csum_ref, cnt_ref):
        @pl.when(pl.program_id(1) == 0)
        def _():
            csum_ref[...] = jnp.zeros_like(csum_ref)
            cnt_ref[...] = jnp.zeros_like(cnt_ref)
        lab, feat = _masked_inputs(lab_ref, feat_ref)
        csum, cnt = _segment_sums(lab, feat, kp)
        csum_ref[...] += csum
        cnt_ref[...] += cnt

    def tight_kernel(p_ref, lab_ref, feat_ref, acc_ref):
        @pl.when(pl.program_id(1) == 0)
        def _():
            acc_ref[...] = jnp.zeros_like(acc_ref)
        lab, feat = _masked_inputs(lab_ref, feat_ref)
        tsum, tcnt = _tightness(lab, feat, p_ref[...])
        lane128 = jax.lax.broadcasted_iota(jnp.int32, (1, 128), 1)
        acc_ref[...] += jnp.where(lane128 == 0, tsum, 0.0) + jnp.where(lane128 == 1, tcnt, 0.0)

    return center_kernel, tight_kernel


# ----------------------------- fused kernel (features resident in VMEM) -----------------------------
def _make_fused_kernel(kp):
    def fused_kernel(lab_ref, feat_ref, csum_ref, cnt_ref, acc_ref):
        lab = lab_ref[...]                                          # [1, N]
        feat = feat_ref[...]                                        # [N, C]
        csum, cnt = _segment_sums(lab, feat, kp)
        csum_ref[...] = csum
        cnt_ref[...] = cnt
        # prototypes: class mean, L2-normalized (rsqrt -> EUP)
        present = cnt > 0.0
        center = csum / jnp.maximum(cnt, 1.0)
        inv_c = jax.lax.rsqrt(jnp.maximum(jnp.sum(center * center, axis=1, keepdims=True), 1e-24))
        p = jnp.where(present, center * inv_c, 0.0)                 # [kp, C]
        tsum, tcnt = _tightness(lab, feat, p)
        lane128 = jax.lax.broadcasted_iota(jnp.int32, (1, 128), 1)
        acc_ref[...] = jnp.where(lane128 == 0, tsum, 0.0) + jnp.where(lane128 == 1, tcnt, 0.0)
    return fused_kernel


# ----------------------------- JAX glue: prototypes + pairwise "entropy" -----------------------------
def _prototypes_and_entropy(csum, cnt, margin):
    counts = cnt[:, 0]
    present = counts > 0.0
    center = csum / jnp.maximum(counts, 1.0)[:, None]
    p = center * jax.lax.rsqrt(
        jnp.maximum(jnp.sum(center * center, axis=1, keepdims=True), 1e-24))
    p = jnp.where(present[:, None], p, 0.0)
    sq = jnp.sum(p * p, axis=1)
    d2 = sq[:, None] + sq[None, :] - 2.0 * (p @ p.T)
    d = jnp.sqrt(jnp.maximum(d2, 1e-12))
    kp = csum.shape[0]
    iu = jnp.triu(jnp.ones((kp, kp), dtype=bool), 1)
    pm = iu & present[:, None] & present[None, :]
    # TODO(synk): with <2 present classes PyTorch's mean over an empty tensor is NaN; we return 0.
    entropy = margin * jnp.sum(jnp.where(pm, d, 0.0)) / jnp.maximum(
        jnp.sum(pm.astype(jnp.float32)), 1.0)
    return p, entropy


def _budgets():
    """Generation-aware VMEM budgets (v5e/v6e: 128 MiB physical VMEM, v7x: 64 MiB)."""
    try:
        cap = pltpu.get_tpu_info().vmem_capacity_bytes
    except Exception:
        cap = 64 * 1024 * 1024  # conservative default
    if cap >= 100 * 1024 * 1024:      # v5e / v6e
        return dict(fused_max_feat=36 << 20, vmem_limit=100 << 20,
                    stream_budget=28 << 20, max_tile=8192)
    else:                              # v7x
        return dict(fused_max_feat=16 << 20, vmem_limit=48 << 20,
                    stream_budget=12 << 20, max_tile=4096)


# ----------------------------- wrapper -----------------------------
def ordinal_entropy_loss(features, labels, *, num_classes, margin=1.0,
                         lambda_d_phn=1.0, lambda_t_phn=1.0, force_two_pass=False):
    features = jnp.asarray(features, dtype=jnp.float32)
    n, c = features.shape
    lab_row = jnp.asarray(labels).reshape(1, n).astype(jnp.int32)   # lane-dense labels (tiny)
    # TODO(synk): labels assumed in [-1, num_classes); labels >= num_classes are not grouped
    # into new classes the way torch.unique would.
    kp = _round_up(max(num_classes, 1), 8)                          # sublane-dense class dim

    cfg = _budgets()
    feat_bytes = n * c * 4
    fused = (not force_two_pass) and (feat_bytes <= cfg["fused_max_feat"])

    if fused:
        # Features resident in VMEM: single kernel, features read from HBM exactly once.
        csum, cnt, acc = pl.pallas_call(
            _make_fused_kernel(kp),
            out_shape=(jax.ShapeDtypeStruct((kp, c), jnp.float32),
                       jax.ShapeDtypeStruct((kp, 1), jnp.float32),
                       jax.ShapeDtypeStruct((1, 128), jnp.float32)),
            compiler_params=pltpu.CompilerParams(vmem_limit_bytes=cfg["vmem_limit"]),
        )(lab_row, features)
        _, entropy = _prototypes_and_entropy(csum, cnt, margin)
    else:
        # Streaming two-pass path. Tile sized from the per-generation double-buffer budget.
        tile_n = (cfg["stream_budget"] // (2 * c * 4)) // 128 * 128
        tile_n = max(128, min(cfg["max_tile"], tile_n))
        tile_n = min(tile_n, _round_up(n, 128))
        nc = 2                                     # leading "parallel" axis -> 2 TCs on v7x; harmless on 1-TC chips
        num_blocks = _cdiv(n, tile_n)
        steps = _cdiv(num_blocks, nc)
        center_kernel, tight_kernel = _make_stream_kernels(n, tile_n, steps, kp)

        # Clamp the block index so no DMA is issued fully out of bounds; the kernel masks duplicate
        # / ragged rows by the unclamped global row index, so clamped tiles contribute zero.
        fmap = lambda ci, i: (jnp.minimum(ci * steps + i, num_blocks - 1), 0)
        lmap = lambda ci, i: (0, jnp.minimum(ci * steps + i, num_blocks - 1))
        params = pltpu.CompilerParams(dimension_semantics=("parallel", "arbitrary"),
                                      vmem_limit_bytes=cfg["vmem_limit"])

        # Pass A: one-hot segment-sum over classes -> per-core per-class feature sums + counts
        csum_p, cnt_p = pl.pallas_call(
            center_kernel,
            out_shape=(jax.ShapeDtypeStruct((nc, kp, c), jnp.float32),
                       jax.ShapeDtypeStruct((nc, kp, 1), jnp.float32)),
            grid=(nc, steps),
            in_specs=[pl.BlockSpec((1, tile_n), lmap),
                      pl.BlockSpec((tile_n, c), fmap)],
            out_specs=(pl.BlockSpec((None, kp, c), lambda ci, i: (ci, 0, 0)),
                       pl.BlockSpec((None, kp, 1), lambda ci, i: (ci, 0, 0))),
            compiler_params=params,
        )(lab_row, features)
        csum = jnp.sum(csum_p, axis=0)
        cnt = jnp.sum(cnt_p, axis=0)

        p, entropy = _prototypes_and_entropy(csum, cnt, margin)

        # Pass B: weighted tightness accumulated into per-core lane-dense (1,128) partials
        acc_p = pl.pallas_call(
            tight_kernel,
            out_shape=jax.ShapeDtypeStruct((nc, 1, 128), jnp.float32),
            grid=(nc, steps),
            in_specs=[pl.BlockSpec((kp, c), lambda ci, i: (0, 0)),
                      pl.BlockSpec((1, tile_n), lmap),
                      pl.BlockSpec((tile_n, c), fmap)],
            out_specs=pl.BlockSpec((None, 1, 128), lambda ci, i: (ci, 0, 0)),
            compiler_params=params,
        )(p, lab_row, features)
        acc = jnp.sum(acc_p, axis=0)

    tsum = acc[0, 0]
    tcnt = acc[0, 1]
    tight_mean = tsum / jnp.maximum(tcnt, 1.0)
    return lambda_t_phn * tight_mean - lambda_d_phn * entropy


# ----------------------------- pure-JAX reference -----------------------------
def reference_loss(features, labels, num_classes, margin=1.0, lambda_d=1.0, lambda_t=1.0):
    feat = features.astype(jnp.float32)
    lab = labels.reshape(-1).astype(jnp.int32)
    valid = lab >= 0
    oh = ((lab[:, None] == jnp.arange(num_classes)[None, :]) & valid[:, None]).astype(jnp.float32)
    counts = oh.sum(0)
    center = (oh.T @ feat) / jnp.maximum(counts, 1.0)[:, None]
    nrm = jnp.sqrt(jnp.sum(center ** 2, axis=1, keepdims=True))
    p = center / jnp.maximum(nrm, 1e-12)
    present = counts > 0
    p = jnp.where(present[:, None], p, 0.0)
    sq = jnp.sum(p ** 2, axis=1)
    d2 = sq[:, None] + sq[None, :] - 2.0 * (p @ p.T)
    d = jnp.sqrt(jnp.maximum(d2, 1e-12))
    iu = jnp.triu(jnp.ones((num_classes, num_classes), bool), 1)
    pm = iu & present[:, None] & present[None, :]
    ent = margin * jnp.sum(jnp.where(pm, d, 0.0)) / jnp.maximum(jnp.sum(pm.astype(jnp.float32)), 1.0)
    fn = feat / jnp.maximum(jnp.sqrt(jnp.sum(feat ** 2, axis=1, keepdims=True)), 1e-12)
    tight = jnp.sum((fn - oh @ p) ** 2, axis=1)
    tm = (tight > 0) & valid
    tmean = (jnp.sum(jnp.where(tm, tight * lab.astype(jnp.float32), 0.0))
             / jnp.maximum(jnp.sum(tm.astype(jnp.float32)), 1.0))
    return lambda_t * tmean - lambda_d * ent


if __name__ == "__main__":
    key = jax.random.PRNGKey(0)
    kf, kl = jax.random.split(key)
    N, C, K = 128, 32, 8                           # accumulated features [N, C], labels [N]
    features = jax.random.normal(kf, (N, C), dtype=jnp.float32)
    labels = jax.random.randint(kl, (N,), -1, K)   # -1 == ignore_index

    ref = reference_loss(features, labels, K, margin=1.0, lambda_d=1.0, lambda_t=1.0)

    # fused path (features resident in VMEM)
    loss_fused = ordinal_entropy_loss(features, labels, num_classes=K,
                                      margin=1.0, lambda_d_phn=1.0, lambda_t_phn=1.0)
    loss_fused = jax.block_until_ready(loss_fused)
    np.testing.assert_allclose(np.asarray(loss_fused), np.asarray(ref), rtol=1e-3, atol=1e-3)

    # streaming two-pass path (exercised explicitly so both code paths are tested on TPU)
    loss_stream = ordinal_entropy_loss(features, labels, num_classes=K,
                                       margin=1.0, lambda_d_phn=1.0, lambda_t_phn=1.0,
                                       force_two_pass=True)
    loss_stream = jax.block_until_ready(loss_stream)
    np.testing.assert_allclose(np.asarray(loss_stream), np.asarray(ref), rtol=1e-3, atol=1e-3)

    assert np.isfinite(np.asarray(loss_fused)) and np.isfinite(np.asarray(loss_stream))
    print("KERNEL_OK")
</pallas_src>

<mosaic_0001>
module attributes {stable_mosaic.version = 11 : i64} {
  func.func @fused_kernel(%arg0: memref<1x128xi32, #tpu.memory_space<vmem>>, %arg1: memref<128x32xf32, #tpu.memory_space<vmem>>, %arg2: memref<8x32xf32, #tpu.memory_space<vmem>>, %arg3: memref<8x1xf32, #tpu.memory_space<vmem>>, %arg4: memref<1x128xf32, #tpu.memory_space<vmem>>) attributes {dimension_semantics = [], scalar_prefetch = 0 : i64, scratch_operands = 0 : i64, tpu.core_type = #tpu.core_type<tc>} {
    %c0 = arith.constant 0 : index
    %c0_0 = arith.constant 0 : index
    %0 = vector.load %arg0[%c0, %c0_0] : memref<1x128xi32, #tpu.memory_space<vmem>>, vector<1x128xi32>
    %c0_1 = arith.constant 0 : index
    %c0_2 = arith.constant 0 : index
    %1 = vector.load %arg1[%c0_1, %c0_2] : memref<128x32xf32, #tpu.memory_space<vmem>>, vector<128x32xf32>
    %2 = tpu.iota {dimensions = array<i32: 0>} : vector<8x128xi32>
    %3 = vector.broadcast %0 : vector<1x128xi32> to vector<8x128xi32>
    %4 = arith.cmpi eq, %3, %2 : vector<8x128xi32>
    %5 = arith.extui %4 : vector<8x128xi1> to vector<8x128xi32>
    %6 = arith.sitofp %5 : vector<8x128xi32> to vector<8x128xf32>
    %cst = arith.constant dense<0.000000e+00> : vector<8x32xf32>
    %7 = tpu.matmul %6, %1, %cst {dimension_numbers = #tpu.dot_dimension_numbers<[1], [0], [0], [1], [0, 0, 1, 1], [], []>} : vector<8x128xf32>, vector<128x32xf32>, vector<8x32xf32> -> vector<8x32xf32>
    %cst_3 = arith.constant dense<0.000000e+00> : vector<8xf32>
    %8 = vector.multi_reduction <add>, %6, %cst_3 [1] : vector<8x128xf32> to vector<8xf32>
    %9 = vector.shape_cast %8 : vector<8xf32> to vector<8x1xf32>
    %c0_4 = arith.constant 0 : index
    %c0_5 = arith.constant 0 : index
    %10 = vector.load %arg2[%c0_4, %c0_5] : memref<8x32xf32, #tpu.memory_space<vmem>>, vector<8x32xf32>
    tpu.vector_store %arg2[%c0_4, %c0_5], %7 {strides = array<i32>} : memref<8x32xf32, #tpu.memory_space<vmem>>, vector<8x32xf32>,
    %c0_6 = arith.constant 0 : index
    %c0_7 = arith.constant 0 : index
    %11 = vector.load %arg3[%c0_6, %c0_7] : memref<8x1xf32, #tpu.memory_space<vmem>>, vector<8x1xf32>
    tpu.vector_store %arg3[%c0_6, %c0_7], %9 {strides = array<i32>} : memref<8x1xf32, #tpu.memory_space<vmem>>, vector<8x1xf32>,
    %cst_8 = arith.constant 0.000000e+00 : f32
    %12 = vector.broadcast %cst_8 : f32 to vector<8x1xf32>
    %13 = arith.cmpf ogt, %9, %12 : vector<8x1xf32>
    %cst_9 = arith.constant 1.000000e+00 : f32
    %14 = vector.broadcast %cst_9 : f32 to vector<8x1xf32>
    %15 = arith.maximumf %9, %14 : vector<8x1xf32>
    %16 = vector.broadcast %15 : vector<8x1xf32> to vector<8x32xf32>
    %17 = arith.divf %7, %16 : vector<8x32xf32>
    %18 = arith.mulf %17, %17 : vector<8x32xf32>
    %cst_10 = arith.constant dense<0.000000e+00> : vector<8xf32>
    %19 = vector.multi_reduction <add>, %18, %cst_10 [1] : vector<8x32xf32> to vector<8xf32>
    %20 = vector.shape_cast %19 : vector<8xf32> to vector<8x1xf32>
    %cst_11 = arith.constant 1.000000e-24 : f32
    %21 = vector.broadcast %cst_11 : f32 to vector<8x1xf32>
    %22 = arith.maximumf %20, %21 : vector<8x1xf32>
    %23 = math.rsqrt %22 : vector<8x1xf32>
    %24 = vector.broadcast %23 : vector<8x1xf32> to vector<8x32xf32>
    %25 = arith.mulf %17, %24 : vector<8x32xf32>
    %cst_12 = arith.constant 0.000000e+00 : f32
    %26 = vector.shape_cast %13 : vector<8x1xi1> to vector<8x1xi1>
    %27 = vector.broadcast %26 : vector<8x1xi1> to vector<8x32xi1>
    %28 = vector.broadcast %cst_12 : f32 to vector<8x32xf32>
    %29 = arith.select %27, %25, %28 : vector<8x32xi1>, vector<8x32xf32>
    %30 = arith.mulf %1, %1 : vector<128x32xf32>
    %cst_13 = arith.constant dense<0.000000e+00> : vector<128xf32>
    %31 = vector.multi_reduction <add>, %30, %cst_13 [1] : vector<128x32xf32> to vector<128xf32>
    %32 = vector.shape_cast %31 : vector<128xf32> to vector<128x1xf32>
    %cst_14 = arith.constant 1.000000e-24 : f32
    %33 = vector.broadcast %cst_14 : f32 to vector<128x1xf32>
    %34 = arith.maximumf %32, %33 : vector<128x1xf32>
    %35 = math.rsqrt %34 : vector<128x1xf32>
    %36 = vector.broadcast %35 : vector<128x1xf32> to vector<128x32xf32>
    %37 = arith.mulf %1, %36 : vector<128x32xf32>
    %cst_15 = arith.constant dense<0.000000e+00> : vector<8x128xf32>
    %38 = tpu.matmul %29, %37, %cst_15 {dimension_numbers = #tpu.dot_dimension_numbers<[1], [1], [0], [0], [0, 0, 1, 0], [], []>} : vector<8x32xf32>, vector<128x32xf32>, vector<8x128xf32> -> vector<8x128xf32>
    %39 = tpu.iota {dimensions = array<i32: 0>} : vector<8x128xi32>
    %40 = vector.broadcast %0 : vector<1x128xi32> to vector<8x128xi32>
    %41 = arith.cmpi eq, %40, %39 : vector<8x128xi32>
    %42 = arith.extui %41 : vector<8x128xi1> to vector<8x128xi32>
    %43 = arith.sitofp %42 : vector<8x128xi32> to vector<8x128xf32>
    %44 = arith.mulf %29, %29 : vector<8x32xf32>
    %cst_16 = arith.constant dense<0.000000e+00> : vector<8xf32>
    %45 = vector.multi_reduction <add>, %44, %cst_16 [1] : vector<8x32xf32> to vector<8xf32>
    %46 = vector.shape_cast %45 : vector<8xf32> to vector<8x1xf32>
    %47 = arith.mulf %43, %38 : vector<8x128xf32>
    %cst_17 = arith.constant dense<0.000000e+00> : vector<128xf32>
    %48 = vector.multi_reduction <add>, %47, %cst_17 [0] : vector<8x128xf32> to vector<128xf32>
    %49 = vector.shape_cast %48 : vector<128xf32> to vector<1x128xf32>
    %50 = vector.broadcast %46 : vector<8x1xf32> to vector<8x128xf32>
    %51 = arith.mulf %43, %50 : vector<8x128xf32>
    %cst_18 = arith.constant dense<0.000000e+00> : vector<128xf32>
    %52 = vector.multi_reduction <add>, %51, %cst_18 [0] : vector<8x128xf32> to vector<128xf32>
    %53 = vector.shape_cast %52 : vector<128xf32> to vector<1x128xf32>
    %c0_i32 = arith.constant 0 : i32
    %54 = vector.broadcast %c0_i32 : i32 to vector<1x128xi32>
    %55 = arith.cmpi sge, %0, %54 : vector<1x128xi32>
    %cst_19 = arith.constant 1.000000e+00 : f32
    %56 = vector.broadcast %cst_19 : f32 to vector<1x128xf32>
    %57 = arith.addf %56, %53 : vector<1x128xf32>
    %cst_20 = arith.constant 2.000000e+00 : f32
    %58 = vector.broadcast %cst_20 : f32 to vector<1x128xf32>
    %59 = arith.mulf %58, %49 : vector<1x128xf32>
    %60 = arith.subf %57, %59 : vector<1x128xf32>
    %cst_21 = arith.constant 0.000000e+00 : f32
    %61 = vector.broadcast %cst_21 : f32 to vector<1x128xf32>
    %62 = arith.maximumf %60, %61 : vector<1x128xf32>
    %cst_22 = arith.constant 0.000000e+00 : f32
    %63 = vector.broadcast %cst_22 : f32 to vector<1x128xf32>
    %64 = arith.cmpf ogt, %62, %63 : vector<1x128xf32>
    %65 = arith.andi %64, %55 : vector<1x128xi1>
    %66 = arith.sitofp %0 : vector<1x128xi32> to vector<1x128xf32>
    %67 = arith.mulf %62, %66 : vector<1x128xf32>
    %cst_23 = arith.constant 0.000000e+00 : f32
    %68 = vector.broadcast %cst_23 : f32 to vector<1x128xf32>
    %69 = arith.select %65, %67, %68 : vector<1x128xi1>, vector<1x128xf32>
    %cst_24 = arith.constant dense<0.000000e+00> : vector<1xf32>
    %70 = vector.multi_reduction <add>, %69, %cst_24 [1] : vector<1x128xf32> to vector<1xf32>
    %71 = vector.shape_cast %70 : vector<1xf32> to vector<1x1xf32>
    %72 = arith.extui %65 : vector<1x128xi1> to vector<1x128xi32>
    %73 = arith.sitofp %72 : vector<1x128xi32> to vector<1x128xf32>
    %cst_25 = arith.constant dense<0.000000e+00> : vector<1xf32>
    %74 = vector.multi_reduction <add>, %73, %cst_25 [1] : vector<1x128xf32> to vector<1xf32>
    %75 = vector.shape_cast %74 : vector<1xf32> to vector<1x1xf32>
    %76 = tpu.iota {dimensions = array<i32: 1>} : vector<1x128xi32>
    %c0_i32_26 = arith.constant 0 : i32
    %77 = vector.broadcast %c0_i32_26 : i32 to vector<1x128xi32>
    %78 = arith.cmpi eq, %76, %77 : vector<1x128xi32>
    %cst_27 = arith.constant 0.000000e+00 : f32
    %79 = vector.shape_cast %71 : vector<1x1xf32> to vector<1x1xf32>
    %80 = vector.broadcast %79 : vector<1x1xf32> to vector<1x128xf32>
    %81 = vector.broadcast %cst_27 : f32 to vector<1x128xf32>
    %82 = arith.select %78, %80, %81 : vector<1x128xi1>, vector<1x128xf32>
    %c1_i32 = arith.constant 1 : i32
    %83 = vector.broadcast %c1_i32 : i32 to vector<1x128xi32>
    %84 = arith.cmpi eq, %76, %83 : vector<1x128xi32>
    %cst_28 = arith.constant 0.000000e+00 : f32
    %85 = vector.shape_cast %75 : vector<1x1xf32> to vector<1x1xf32>
    %86 = vector.broadcast %85 : vector<1x1xf32> to vector<1x128xf32>
    %87 = vector.broadcast %cst_28 : f32 to vector<1x128xf32>
    %88 = arith.select %84, %86, %87 : vector<1x128xi1>, vector<1x128xf32>
    %89 = arith.addf %82, %88 : vector<1x128xf32>
    %c0_29 = arith.constant 0 : index
    %c0_30 = arith.constant 0 : index
    %90 = vector.load %arg4[%c0_29, %c0_30] : memref<1x128xf32, #tpu.memory_space<vmem>>, vector<1x128xf32>
    tpu.vector_store %arg4[%c0_29, %c0_30], %89 {strides = array<i32>} : memref<1x128xf32, #tpu.memory_space<vmem>>, vector<1x128xf32>,
    return
  }
}

</mosaic_0001>

<bundles_post_ra>
// kernel: tpu_custom_call.1
= control target key start
LH: loop header
LB: loop body
LE: loop exit
PB: predicated region body
PF: predicated region fallthrough
CT: control target
= control target key end

     0   :  { %10 = vsyncpa [#allocation3], 0  ;;  %v33_v3 = vlaneseq  ;;  %v712_v4 = vmov 0.0|0.0   ;;  %vm713_vm0 = vmmov 0   ;;  %v714_v7 = vmov 0.0   ;;  %s1009_s0 = inlined_call_operand.vmem [shape: s32[1,128], index: 0, kind: input, shape index: {}]   ;;  %s1010_s1 = inlined_call_operand.vmem [shape: f32[128,32], index: 1, kind: input, shape index: {}]   ;;  %s1011_s2 = inlined_call_operand.hbm [shape: f32[8,32], index: 2, kind: output, shape index: {0}]   ;;  %s1012_s3 = inlined_call_operand.vmem [shape: f32[8,1], index: 3, kind: output, shape index: {1}]   ;;  %s1013_s4 = inlined_call_operand.hbm [shape: f32[1,128], index: 4, kind: output, shape index: {2}]  }
   0x1   :  { %v746_v0 = vld [vmem:[%s1010_s1] sm:$0xff]  ;;  %v751_v1 = vld [vmem:[%s1010_s1 + $0x8] sm:$0xff]  ;;  %v756_v2 = vld [vmem:[%s1010_s1 + $0x10] sm:$0xff]  ;;  %566 = vmatprep.subr.bf16.mxu0 %v712_v4  ;;  %528 = vmatprep.mubr.msk.f32.mxu0 %vm713_vm0, %v714_v7  ;;  %vm114_vm1 = vcmask 261120  }
   0x2   :  { %v567_v5 = vpack.c.bf16 %v751_v1, %v746_v0  ;;  %v764_v6 = vld [vmem:[%s1010_s1 + $0x18] sm:$0xff]  ;;  %v133_v8 = vmul.f32 %v751_v1, %v751_v1  ;;  %v770_v9 = vshrl.u32 %v33_v3, 7  ;;  %590 = vmatprep.subr.bf16.mxu1 %v712_v4  ;;  %563 = vmatprep.mubr.msk.f32.mxu1 %vm713_vm0, %v714_v7  ;;  %v134_v12 = vmul.f32 %v756_v2, %v756_v2  ;;  %v783_v13 = vld [vmem:[%s1010_s1 + $0x20] sm:$0xff]  ;;  %v788_v14 = vld [vmem:[%s1010_s1 + $0x28] sm:$0xff] }
   0x3   :  { %v570_v10 = vpack.c.bf16 %v764_v6, %v756_v2  ;;  %v794_v16 = vld [vmem:[%s1009_s0] sm:$0x1]  ;;  %v136_v18 = vmul.f32 %v783_v13, %v783_v13 }
   0x4   :  { %568 = vmatpush3.bf16.msra.mxu0 %v567_v5  ;;  %v151_v11 = vsel %vm114_vm1, %v133_v8, 0.0  ;;  %v37_v15 = vsub.s32 0, %v770_v9  ;;  %v154_v17 = vsel %vm114_vm1, %v134_v12, 0.0 }
   0x5   :  { %569 = vmatprep.subr.bf16.mxu0 %v712_v4  ;;  %152 = vadd.xlane.f32.xlu1 %v151_v11 }
   0x6   :  { %v800_v19 = vrot.slane %v794_v16, %v37_v15 }
   0x7   :  { %11 = vsyncpa [#allocation5], 0  ;;  %v573_v20 = vpack.c.bf16 %v788_v14, %v783_v13  ;;  %v132_v21 = vmul.f32 %v746_v0, %v746_v0  ;;  %v810_v22 = vld [vmem:[%s1010_s1 + $0x30] sm:$0xff]  ;;  %v815_v23 = vld [vmem:[%s1010_s1 + $0x38] sm:$0xff]  ;;  %v160_v25 = vsel %vm114_vm1, %v136_v18, 0.0  ;;  %v135_v29 = vmul.f32 %v764_v6, %v764_v6 }
   0x8   :  { %571 = vmatpush3.bf16.msra.mxu0 %v570_v10  ;;  %vm39_vm2 = vcmp.eq.s32.totalorder %v800_v19, %v770_v9  ;;  %v138_v26 = vmul.f32 %v810_v22, %v810_v22  ;;  %v576_v27 = vpack.c.bf16 %v815_v23, %v810_v22  ;;  %v838_v30 = vld [vmem:[%s1010_s1 + $0x40] sm:$0xff]  ;;  %v843_v31 = vld [vmem:[%s1010_s1 + $0x48] sm:$0xff]  ;;  %v137_v36 = vmul.f32 %v788_v14, %v788_v14  ;;  %v857_v37 = vld [vmem:[%s1010_s1 + $0x50] sm:$0xff] }
   0x9   :  { %572 = vmatprep.subr.bf16.mxu0 %v712_v4  ;;  %155 = vadd.xlane.f32.xlu1 %v154_v17  ;;  %v823_v24 = vsel %vm39_vm2, 1.0, %v714_v7  ;;  %v148_v28 = vsel %vm114_vm1, %v132_v21, 0.0  ;;  %v140_v33 = vmul.f32 %v838_v30, %v838_v30  ;;  %v579_v34 = vpack.c.bf16 %v843_v31, %v838_v30  ;;  %v862_v38 = vld [vmem:[%s1010_s1 + $0x58] sm:$0xff]  ;;  %v876_v44 = vld [vmem:[%s1010_s1 + $0x60] sm:$0xff]  ;;  %v881_v45 = vld [vmem:[%s1010_s1 + $0x68] sm:$0xff] }
   0xa   :  { %112 = vadd.xlane.f32.xlu0 %v823_v24  ;;  %v166_v32 = vsel %vm114_vm1, %v138_v26, 0.0  ;;  %v157_v35 = vsel %vm114_vm1, %v135_v29, 0.0  ;;  %v142_v40 = vmul.f32 %v857_v37, %v857_v37  ;;  %v582_v41 = vpack.c.bf16 %v862_v38, %v857_v37  ;;  %v893_v50 = vld [vmem:[%s1010_s1 + $0x70] sm:$0xff]  ;;  %v898_v51 = vld [vmem:[%s1010_s1 + $0x78] sm:$0xff]  ;;  %vm932_vm4 = vmpackc.low %vm114_vm1, %vm114_vm1 }
   0xb   :  { %v172_v39 = vsel %vm114_vm1, %v140_v33, 0.0  ;;  %v163_v42 = vsel %vm114_vm1, %v137_v36, 0.0  ;;  %v139_v43 = vmul.f32 %v815_v23, %v815_v23  ;;  %v585_v47 = vpack.c.bf16 %v881_v45, %v876_v44 }
   0xc   :  { %574 = vmatpush3.bf16.msra.mxu0 %v573_v20  ;;  %v178_v46 = vsel %vm114_vm1, %v142_v40, 0.0  ;;  %v141_v49 = vmul.f32 %v843_v31, %v843_v31  ;;  %v144_v52 = vmul.f32 %v876_v44, %v876_v44  ;;  %v146_v53 = vmul.f32 %v893_v50, %v893_v50 }
   0xd   :  { %575 = vmatprep.subr.bf16.mxu0 %v712_v4  ;;  %161 = vadd.xlane.f32.xlu1 %v160_v25  ;;  %v169_v48 = vsel %vm114_vm1, %v139_v43, 0.0  ;;  %v588_v54 = vpack.c.bf16 %v898_v51, %v893_v50  ;;  %v143_v56 = vmul.f32 %v862_v38, %v862_v38  ;;  %v145_v60 = vmul.f32 %v881_v45, %v881_v45 }
   0xe   :  { %149 = vadd.xlane.f32.xlu0 %v148_v28  ;;  %v175_v55 = vsel %vm114_vm1, %v141_v49, 0.0  ;;  %v184_v57 = vsel %vm114_vm1, %v144_v52, 0.0  ;;  %v190_v58 = vsel %vm114_vm1, %v146_v53, 0.0  ;;  %v715_v61 = vmov 1.0  }
   0xf   :  { %v181_v59 = vsel %vm114_vm1, %v143_v56, 0.0  ;;  %v187_v62 = vsel %vm114_vm1, %v145_v60, 0.0  ;;  %v147_v63 = vmul.f32 %v898_v51, %v898_v51  ;;  %vm116_vm3 = vcmask 7168  }
  0x10   :  { %577 = vmatpush3.bf16.msra.mxu0 %v576_v27  ;;  %vm383_vm6 = vcmp.ge.s32.totalorder %v794_v16, 0  ;;  %vm393_vm8 = vcmask 1040384  }
  0x11   :  { %578 = vmatprep.subr.bf16.mxu0 %v712_v4  ;;  %167 = vadd.xlane.f32.xlu1 %v166_v32  ;;  %v193_v5 = vsel %vm114_vm1, %v147_v63, 0.0 }
  0x12   :  { %158 = vadd.xlane.f32.xlu0 %v157_v35 }
  0x14   :  { %580 = vmatpush3.bf16.msra.mxu0 %v579_v34 }
  0x15   :  { %581 = vmatprep.subr.bf16.mxu0 %v712_v4  ;;  %173 = vadd.xlane.f32.xlu1 %v172_v39 }
  0x16   :  { %164 = vadd.xlane.f32.xlu0 %v163_v42 }
  0x18   :  { %583 = vmatpush3.bf16.msra.mxu0 %v582_v41 }
  0x19   :  { %584 = vmatprep.subr.bf16.mxu0 %v712_v4  ;;  %179 = vadd.xlane.f32.xlu1 %v178_v46 }
  0x1a   :  { %170 = vadd.xlane.f32.xlu0 %v169_v48 }
  0x1c   :  { %586 = vmatpush3.bf16.msra.mxu0 %v585_v47 }
  0x1d   :  { %587 = vmatprep.subr.bf16.mxu0 %v712_v4  ;;  %185 = vadd.xlane.f32.xlu1 %v184_v57 }
  0x1e   :  { %176 = vadd.xlane.f32.xlu0 %v175_v55 }
  0x20   :  { %589 = vmatpush3.bf16.msra.mxu0 %v588_v54 }
  0x21   :  { %191 = vadd.xlane.f32.xlu1 %v190_v58 }
  0x22   :  { %182 = vadd.xlane.f32.xlu0 %v181_v59 }
  0x23   :  { %529 = vmatmul.mubr.msk.f32.vlgmr.msra.gmra.mrb[0].mxu0 %vm39_vm2, %v715_v61 }
  0x26   :  { %188 = vadd.xlane.f32.xlu0 %v187_v62 }
  0x2a   :  { %194 = vadd.xlane.f32.xlu0 %v193_v5 }
  0x92   :  { %v153_v8 = vpop.xlane.xlu1 %152 }
  0x93   :  { %v197_v10 = vmax.f32 %v153_v8, 1e-24 }
  0x95   :  { %628 = vrsqrt.f32 %v197_v10 }
  0x96   :  { %v156_v9 = vpop.xlane.xlu1 %155 }
  0x97   :  { %v922_v11 = vpop.xlane.xlu0 %112  ;;  %v198_v17 = vmax.f32 %v156_v9, 1e-24 }
  0x98   :  { %117 = vst.msk [vmem:[%s1012_s3] sm:$0xff] %vm116_vm3, %v922_v11  ;;  %vm118_vm5 = vcmp.gt.f32.partialorder %v922_v11, 0.0  ;;  %s716_s3 = smov [#allocation2]  }
  0x99   :  { %s416_s23 = sshll.u32 %s716_s3, 4  ;;  %s417_s23 = int_to_ptr.vmem [resolvable:$true] %s416_s23 }
  0x9a   :  { %v162_v20 = vpop.xlane.xlu1 %161  ;;  %s664_s24 = scalar_lea.vmem %s417_s23, 128  ;;  %p669_p1 = scmp.lt.s32.totalorder %s417_s23, %s417_s23 }
  0x9b   :  { %v150_v12 = vpop.xlane.xlu0 %149  ;;  %v200_v21 = vmax.f32 %v162_v20, 1e-24  ;;  %p665_p0 = scmp.ne.s32.totalorder %s417_s23, %s664_s24  ;;  %p670_p2 = scmp.lt.s32.totalorder %s664_s24, %s664_s24 }
  0x9c   :  { %v196_v15 = vmax.f32 %v150_v12, 1e-24 }
  0x9d   :  { %p671_p3 = por %p670_p2, %p669_p1 }
  0x9e   :  { %630 = vrsqrt.f32 %v196_v15  ;;  %v168_v32 = vpop.xlane.xlu1 %167 }
  0x9f   :  { %v159_v18 = vpop.xlane.xlu0 %158  ;;  %632 = vrsqrt.f32 %v198_v17  ;;  %v629_v26 = vpop.eup %628  ;;  %v202_v40 = vmax.f32 %v168_v32, 1e-24  ;;  %p672_p4 = pnand %p671_p3, %p665_p0 }
  0xa0   :  { %v199_v19 = vmax.f32 %v159_v18, 1e-24  ;;  %v229_v28 = vmul.f32 %v629_v26, %v751_v1 }
  0xa2   :  { %634 = vrsqrt.f32 %v199_v19 }
  0xa3   :  { %v165_v25 = vpop.xlane.xlu0 %164  ;;  %636 = vrsqrt.f32 %v200_v21 }
  0xa4   :  { %v201_v27 = vmax.f32 %v165_v25, 1e-24 }
  0xa6   :  { %638 = vrsqrt.f32 %v201_v27 }
  0xa7   :  { %v171_v34 = vpop.xlane.xlu0 %170  ;;  %640 = vrsqrt.f32 %v202_v40 }
  0xa8   :  { %v631_v29 = vpop.eup %630  ;;  %v203_v42 = vmax.f32 %v171_v34, 1e-24 }
  0xa9   :  { %v228_v33 = vmul.f32 %v631_v29, %v746_v0  ;;  %v633_v35 = vpop.eup %632  ;;  %v174_v0 = vpop.xlane.xlu1 %173 }
  0xaa   :  { %v230_v1 = vmul.f32 %v633_v35, %v756_v2  ;;  %642 = vrsqrt.f32 %v203_v42  ;;  %v204_v52 = vmax.f32 %v174_v0, 1e-24 }
  0xab   :  { %v591_v39 = vpack.c.bf16 %v229_v28, %v228_v33  ;;  %v177_v48 = vpop.xlane.xlu0 %176 }
  0xac   :  { %v635_v41 = vpop.eup %634  ;;  %v205_v53 = vmax.f32 %v177_v48, 1e-24  ;;  %644 = vrsqrt.f32 %v204_v52 }
  0xad   :  { %593 = vmatpush3.bf16.xpose.msk.msra.mxu1 %vm932_vm4, %v591_v39  ;;  %v231_v43 = vmul.f32 %v635_v41, %v764_v6  ;;  %v637_v46 = vpop.eup %636  ;;  %v180_v6 = vpop.xlane.xlu1 %179 }
  0xae   :  { %594 = vmatprep.subr.bf16.mxu1 %v712_v4  ;;  %v232_v54 = vmul.f32 %v637_v46, %v783_v13  ;;  %646 = vrsqrt.f32 %v205_v53  ;;  %v206_v59 = vmax.f32 %v180_v6, 1e-24 }
  0xaf   :  { %v595_v47 = vpack.c.bf16 %v231_v43, %v230_v1  ;;  %v183_v57 = vpop.xlane.xlu0 %182 }
  0xb0   :  { %v639_v49 = vpop.eup %638  ;;  %v207_v60 = vmax.f32 %v183_v57, 1e-24  ;;  %648 = vrsqrt.f32 %v206_v59 }
  0xb1   :  { %v233_v2 = vmul.f32 %v639_v49, %v788_v14  ;;  %v641_v55 = vpop.eup %640 }
  0xb2   :  { %v234_v61 = vmul.f32 %v641_v55, %v810_v22  ;;  %650 = vrsqrt.f32 %v207_v60 }
  0xb3   :  { %v599_v56 = vpack.c.bf16 %v233_v2, %v232_v54  ;;  %v189_v17 = vpop.xlane.xlu0 %188 }
  0xb4   :  { %v643_v58 = vpop.eup %642  ;;  %v209_v21 = vmax.f32 %v189_v17, 1e-24 }
  0xb5   :  { %597 = vmatpush3.bf16.xpose.msk.msra.mxu1 %vm932_vm4, %v595_v47  ;;  %v235_v13 = vmul.f32 %v643_v58, %v815_v23 }
  0xb6   :  { %598 = vmatprep.subr.bf16.mxu1 %v712_v4  ;;  %v645_v14 = vpop.eup %644 }
  0xb7   :  { %v603_v62 = vpack.c.bf16 %v235_v13, %v234_v61  ;;  %v236_v5 = vmul.f32 %v645_v14, %v838_v30  ;;  %v119_v30 = vmax.f32 %v922_v11, 1.0  ;;  %v195_v26 = vpop.xlane.xlu0 %194 }
  0xb8   :  { %v647_v63 = vpop.eup %646  ;;  %v211_v32 = vmax.f32 %v195_v26, 1e-24 }
  0xb9   :  { %v237_v8 = vmul.f32 %v647_v63, %v843_v31  ;;  %652 = vrcp.f32 %v119_v30  ;;  %v186_v31 = vpop.xlane.xlu1 %185 }
  0xba   :  { %v649_v10 = vpop.eup %648  ;;  %v208_v19 = vmax.f32 %v186_v31, 1e-24 }
  0xbb   :  { %v607_v22 = vpack.c.bf16 %v237_v8, %v236_v5  ;;  %v238_v23 = vmul.f32 %v649_v10, %v857_v37  ;;  %v390_v5 = vcvt.s32.f32 %v794_v16 }
  0xbc   :  { %v651_v9 = vpop.eup %650  ;;  %654 = vrsqrt.f32 %v208_v19 }
  0xbd   :  { %601 = vmatpush3.bf16.xpose.msk.msra.mxu1 %vm932_vm4, %v599_v56  ;;  %v239_v12 = vmul.f32 %v651_v9, %v862_v38  ;;  %v192_v25 = vpop.xlane.xlu1 %191  ;;  %656 = vrsqrt.f32 %v209_v21 }
  0xbe   :  { %602 = vmatprep.subr.bf16.mxu1 %v712_v4  ;;  %v210_v28 = vmax.f32 %v192_v25, 1e-24 }
  0xbf   :  { %v611_v15 = vpack.c.bf16 %v239_v12, %v238_v23 }
  0xc0   :  { %658 = vrsqrt.f32 %v210_v28 }
  0xc1   :  { %660 = vrsqrt.f32 %v211_v32 }
  0xc3   :  { %v653_v18 = vpop.eup %652 }
  0xc5   :  { %605 = vmatpush3.bf16.xpose.msk.msra.mxu1 %vm932_vm4, %v603_v62 }
  0xc6   :  { %606 = vmatprep.subr.bf16.mxu1 %v712_v4  ;;  %v655_v33 = vpop.eup %654 }
  0xc7   :  { %v657_v34 = vpop.eup %656  ;;  %v240_v35 = vmul.f32 %v655_v33, %v876_v44 }
  0xc8   :  { %v241_v39 = vmul.f32 %v657_v34, %v881_v45 }
  0xca   :  { %v659_v40 = vpop.eup %658  ;;  %v615_v42 = vpack.c.bf16 %v241_v39, %v240_v35 }
  0xcb   :  { %v661_v41 = vpop.eup %660  ;;  %v242_v1 = vmul.f32 %v659_v40, %v893_v50 }
  0xcc   :  { %v243_v43 = vmul.f32 %v661_v41, %v898_v51 }
  0xcd   :  { %609 = vmatpush3.bf16.xpose.msk.msra.mxu1 %vm932_vm4, %v607_v22 }
  0xce   :  { %610 = vmatprep.subr.bf16.mxu1 %v712_v4  ;;  %v619_v0 = vpack.c.bf16 %v243_v43, %v242_v1 }
  0xd5   :  { %613 = vmatpush3.bf16.xpose.msk.msra.mxu1 %vm932_vm4, %v611_v15 }
  0xd6   :  { %614 = vmatprep.subr.bf16.mxu1 %v712_v4 }
  0xdd   :  { %617 = vmatpush3.bf16.xpose.msk.msra.mxu1 %vm932_vm4, %v615_v42 }
  0xde   :  { %618 = vmatprep.subr.bf16.mxu1 %v712_v4 }
  0xe5   :  { %621 = vmatpush3.bf16.xpose.msk.msra.mxu1 %vm932_vm4, %v619_v0 }
  0xf6   :  { %v108_v20 = vpop.f32.mrb[0].mxu0 }
  0xf7   :  { %v121_v37 = vmul.f32 %v653_v18, %v108_v20  ;;  %115 = vst.msk [vmem:[#allocation2] sm:$0xff] %vm114_vm1, %v108_v20  ;;  %v530_v38 = vpop.f32.mrb[1].mxu0 }
  0xf9   :  { %v122_v27 = vmul.f32 %v121_v37, %v121_v37 }
  0xfb   :  { %v123_v29 = vsel %vm114_vm1, %v122_v27, 0.0 }
  0xfc   :  { %124 = vadd.xlane.f32.xlu1 %v123_v29 }
 0x189   :  { %v125_v46 = vpop.xlane.xlu1 %124 }
 0x18a   :  { %v126_v44 = vmax.f32 %v125_v46, 1e-24 }
 0x18c   :  { %662 = vrsqrt.f32 %v126_v44 }
 0x196   :  { %v663_v45 = vpop.eup %662 }
 0x197   :  { %v128_v47 = vmul.f32 %v663_v45, %v121_v37 }
 0x199   :  { %v131_v48 = vsel %vm118_vm5, %v128_v47, 0.0 }
 0x19a   :  { %564 = vmatmul.mubr.msk.f32.vlgmr.msra.gmra.mrb[0].mxu1 %vm114_vm1, %v131_v48  ;;  %v365_v49 = vmul.f32 %v131_v48, %v131_v48 }
 0x19c   :  { %v366_v4 = vsel %vm114_vm1, %v365_v49, 0.0 }
 0x19d   :  { %367 = vadd.xlane.f32.xlu0 %v366_v4 }
 0x22a   :  { %v368_v50 = vpop.xlane.xlu0 %367 }
 0x22b   :  { %v376_v51 = vmul.f32 %v823_v24, %v368_v50 }
 0x22d   :  { %v377_v52 = vrot.slane %v376_v51, 4 }
 0x22f   :  { %v378_v36 = vadd.f32 %v377_v52, %v376_v51 }
 0x231   :  { %v379_v53 = vrot.slane %v378_v36, 2 }
 0x233   :  { %v380_v55 = vadd.f32 %v379_v53, %v378_v36 }
 0x235   :  { %v381_v57 = vrot.slane %v380_v55, 1 }
 0x237   :  { %v382_v60 = vadd.f32 %v381_v57, %v380_v55 }
 0x239   :  { %v384_v14 = vadd.f32 1.0, %v382_v60 }
 0x26d   :  { %v361_v54 = vpop.f32.mrb[0].mxu1 }
 0x26e   :  { %v369_v2 = vmul.f32 %v823_v24, %v361_v54  ;;  %v565_v6 = vpop.f32.mrb[1].mxu1 }
 0x270   :  { %v370_v56 = vrot.slane %v369_v2, 4 }
 0x272   :  { %v371_v11 = vadd.f32 %v370_v56, %v369_v2 }
 0x274   :  { %v372_v58 = vrot.slane %v371_v11, 2 }
 0x276   :  { %v373_v59 = vadd.f32 %v372_v58, %v371_v11 }
 0x278   :  { %v374_v61 = vrot.slane %v373_v59, 1 }
 0x27a   :  { %v375_v13 = vadd.f32 %v374_v61, %v373_v59 }
 0x27c   :  { %v385_v62 = vmul.f32 2.0, %v375_v13 }
 0x27e   :  { %v386_v63 = vsub.f32 %v384_v14, %v385_v62 }
 0x280   :  { %v387_v8 = vmax.f32 %v386_v63, 0.0 }
 0x282   :  { %vm388_vm7 = vcmp.gt.f32.partialorder %v387_v8, 0.0  ;;  %v391_v24 = vmul.f32 %v390_v5, %v387_v8 }
 0x283   :  { %vm389_vm9 = vmand %vm388_vm7, %vm383_vm6 }
 0x284   :  { %v461_v10 = vsel %vm389_vm9, 1.0, %v714_v7  ;;  %v392_v22 = vsel %vm389_vm9, %v391_v24, 0.0 }
 0x285   :  { %v399_v9 = vsel %vm393_vm8, %v461_v10, 0.0  ;;  %v394_v23 = vsel %vm393_vm8, %v392_v22, 0.0 }
 0x286   :  { %400 = vadd.xlane.f32.xlu0 %v399_v9  ;;  %395 = vadd.xlane.f32.xlu1 %v394_v23 }
 0x287   :  { %675 = shalt.err (!%p672_p4)
}
 0x288   :  { %s676_s27 = scalar_lea.hbm %s1011_s2, 128 }
 0x289   :  { %p677_p5 = scmp.ne.s32.totalorder %s1011_s2, %s676_s27  ;;  %p680_p6 = scmp.lt.u32.totalorder %s676_s27, %s1011_s2 }
 0x28b   :  { %p682_p7 = pnand %p680_p6, %p677_p5 }
 0x28d   :  { %685 = shalt.err (!%p682_p7)
}
 0x28e   :  { %419 = dma.vmem_to_hbm [thread:$0]  %s417_s23, 128, %s1011_s2, [#allocation3]   ;;  %v403_v7 = vand.u32 127, %v33_v3 }
 0x28f   :  { %s717_s7 = smov [#allocation4]  }
 0x290   :  { %vm406_vm10 = vcmp.eq.s32.totalorder %v403_v7, 1  ;;  %vm404_vm11 = vcmp.eq.s32.totalorder %v403_v7, 0  ;;  %s428_s8 = sshll.u32 %s717_s7, 4  ;;  %s429_s8 = int_to_ptr.vmem [resolvable:$true] %s428_s8 }
 0x291   :  { %s686_s9 = scalar_lea.vmem %s429_s8, 16  ;;  %s690_s10 = scalar_lea.vmem %s429_s8, 32 }
 0x292   :  { %p687_p8 = scmp.ne.s32.totalorder %s429_s8, %s686_s9  ;;  %p691_p9 = scmp.lt.s32.totalorder %s429_s8, %s429_s8 }
 0x293   :  { %p692_p10 = scmp.lt.s32.totalorder %s690_s10, %s686_s9 }
 0x295   :  { %p693_p11 = por %p692_p10, %p691_p9 }
 0x297   :  { %p694_p12 = pnand %p693_p11, %p687_p8 }
 0x313   :  { %v401_v16 = vpop.xlane.xlu0 %400  ;;  %v396_v12 = vpop.xlane.xlu1 %395 }
 0x314   :  { %v407_v15 = vsel %vm406_vm10, %v401_v16, 0.0  ;;  %v405_v30 = vsel %vm404_vm11, %v396_v12, 0.0 }
 0x315   :  { %v408_v31 = vadd.f32 %v407_v15, %v405_v30 }
 0x317   :  { %409 = vst [vmem:[#allocation4] sm:$0x1] %v408_v31 }
 0x318   :  { %697 = shalt.err (!%p694_p12)
}
 0x319   :  { %s698_s12 = scalar_lea.hbm %s1013_s4, 16 }
 0x31a   :  { %p699_p13 = scmp.ne.s32.totalorder %s1013_s4, %s698_s12  ;;  %p702_p0 = scmp.lt.u32.totalorder %s698_s12, %s1013_s4 }
 0x31c   :  { %p704_p1 = pnand %p702_p0, %p699_p13 }
 0x31e   :  { %707 = shalt.err (!%p704_p1)
}
 0x31f   :  { %431 = dma.vmem_to_hbm [thread:$0]  %s429_s8, 16, %s1013_s4, [#allocation5]  }
 0x320   :  { %708 = dma.done.wait [#allocation3], 128  }
 0x321   :  { %709 = vsyncadd [#allocation3], 4294967168 }
 0x322   :  { %710 = dma.done.wait [#allocation5], 16  }
 0x323   :  { %711 = vsyncadd [#allocation5], 4294967280 }
 0x324   :  { %440 = vsyncpa [#allocation3], 1 }
 0x325   :  { %441 = vsyncpa [#allocation5], 1 }

</bundles_post_ra>
